<compile_context>
chip_gen: v5e
topology: v5e:2x2
jax: 0.10.0
libtpu: 0.0.40
codegen_flags: <defaults>
</compile_context>

<pallas_src>
import math
from functools import partial

import jax
import jax.numpy as jnp
from jax.experimental import pallas as pl
from jax.experimental.pallas import tpu as pltpu


# ----------------------------------------------------------------------------
# Kernels
# ----------------------------------------------------------------------------

def _ffn_resident_kernel(x_ref, w1_ref, b1_ref, w2_ref, b2_ref, o_ref):
    """Weights-resident path: full W1/W2 live in VMEM, no reduction axis."""
    h = jnp.dot(x_ref[...], w1_ref[...], preferred_element_type=jnp.float32)
    h = jnp.maximum(h + b1_ref[...].astype(jnp.float32), 0.0)
    # dropout(p=0.1) in eval mode == identity.
    y = jnp.dot(h.astype(w2_ref.dtype), w2_ref[...],
                preferred_element_type=jnp.float32)
    o_ref[...] = (y + b2_ref[...].astype(jnp.float32)).astype(o_ref.dtype)


def _ffn_tiled_kernel(x_ref, w1_ref, b1_ref, w2_ref, b2_ref, o_ref, acc_ref):
    """d_ff-tiled path with an f32 VMEM accumulator (for non-f32 outputs)."""
    j = pl.program_id(1)

    @pl.when(j == 0)
    def _():
        acc_ref[...] = jnp.zeros_like(acc_ref)

    h = jnp.dot(x_ref[...], w1_ref[...], preferred_element_type=jnp.float32)
    h = jnp.maximum(h + b1_ref[...].astype(jnp.float32), 0.0)
    acc_ref[...] += jnp.dot(h.astype(w2_ref.dtype), w2_ref[...],
                            preferred_element_type=jnp.float32)

    @pl.when(j == pl.num_programs(1) - 1)
    def _():
        o_ref[...] = (acc_ref[...]
                      + b2_ref[...].astype(jnp.float32)).astype(o_ref.dtype)


def _ffn_tiled_f32out_kernel(x_ref, w1_ref, b1_ref, w2_ref, b2_ref, o_ref):
    """d_ff-tiled path, f32 output: accumulate into o_ref (no scratch VMEM)."""
    j = pl.program_id(1)

    @pl.when(j == 0)
    def _():
        o_ref[...] = jnp.zeros_like(o_ref)

    h = jnp.dot(x_ref[...], w1_ref[...], preferred_element_type=jnp.float32)
    h = jnp.maximum(h + b1_ref[...].astype(jnp.float32), 0.0)
    o_ref[...] += jnp.dot(h.astype(w2_ref.dtype), w2_ref[...],
                          preferred_element_type=jnp.float32)

    @pl.when(j == pl.num_programs(1) - 1)
    def _():
        o_ref[...] += b2_ref[...].astype(jnp.float32)


# ----------------------------------------------------------------------------
# Tiling helpers
# ----------------------------------------------------------------------------

def _round_up(n: int, m: int) -> int:
    return ((n + m - 1) // m) * m


def _divisor_tile(total: int, desired: int, align: int) -> int:
    """Largest multiple of `align` dividing `total` that is <= desired;
    falls back to the full extent (always a legal block size)."""
    if total <= desired:
        return total
    t = (min(desired, total) // align) * align
    while t >= align:
        if total % t == 0:
            return t
        t -= align
    return total


def _tpu_defaults():
    """Generation-tuned tile sizes, VMEM budget and weights-resident cutoff."""
    kind = ""
    try:
        kind = jax.devices()[0].device_kind.lower()
    except Exception:
        pass
    if "v7" in kind or "tpu7" in kind:   # 64 MiB VMEM/TC, 3.2 TB/s HBM
        return dict(tm=512, tf=512, resident_bytes=24 << 20, budget=48 << 20)
    if "v6" in kind:                     # 128 MiB VMEM, ~650 flops/B crossover
        return dict(tm=1024, tf=1024, resident_bytes=60 << 20, budget=100 << 20)
    if "v5 lite" in kind or "v5e" in kind or "v5lite" in kind:
        return dict(tm=512, tf=1024, resident_bytes=60 << 20, budget=100 << 20)
    # Unknown / older generation: conservative (fits a 64 MiB VMEM part).
    return dict(tm=512, tf=512, resident_bytes=24 << 20, budget=48 << 20)


def _vmem_estimate(row_tile, ff_tile, d_model, d_ff, xb, wb, ob, resident):
    """Rough per-step VMEM footprint (double-buffered streams + temporaries)."""
    ff = d_ff if resident else ff_tile
    h_tmp = row_tile * ff * (4 + wb)                       # f32 h + cast copy
    if resident:
        return (2 * row_tile * d_model * (xb + ob)         # x / out, 2-buffered
                + 2 * d_model * d_ff * wb                  # W1 + W2 (resident)
                + (d_ff + d_model) * wb                    # biases
                + h_tmp)
    return (2 * row_tile * d_model * (xb + ob)             # x / out, 2-buffered
            + 4 * d_model * ff_tile * wb                   # W1 + W2 slabs, 2-buf
            + 2 * (ff_tile + d_model) * wb                 # bias slabs
            + row_tile * d_model * 4                       # f32 accumulator
            + h_tmp)


# ----------------------------------------------------------------------------
# Wrapper
# ----------------------------------------------------------------------------

@partial(jax.jit, static_argnames=("tm", "tf", "resident"))
def position_wise_feed_forward(x, w1, b1, w2, b2, *, tm=None, tf=None,
                               resident=None):
    """fc2(dropout(relu(fc1(x)))) in eval mode.  x: (B, S, d_model)."""
    B, S, d_model = x.shape
    d_ff = w1.shape[1]
    M = B * S

    cfg = _tpu_defaults()
    desired_tm = tm if tm is not None else cfg["tm"]
    desired_tf = tf if tf is not None else cfg["tf"]

    xb = x.dtype.itemsize
    wb = w1.dtype.itemsize
    ob = x.dtype.itemsize
    w_bytes = (w1.size + w2.size) * wb
    if resident is None:
        resident = w_bytes <= cfg["resident_bytes"]

    # Row tile: MXU-aligned (multiple of 256) when large; tiny inputs get the
    # whole M (rounded to the 8-sublane granule).  M is padded to a multiple of
    # the tile, so awkward B*S never forces a full-M (VMEM-busting) tile.
    if M <= desired_tm:
        row_tile = _round_up(M, 8)
    else:
        row_tile = _round_up(desired_tm, 256)

    ff_tile = d_ff if resident else _divisor_tile(d_ff, desired_tf, 128)

    # Shrink tiles until the working set fits the generation's VMEM budget.
    while (row_tile > 256 and
           _vmem_estimate(row_tile, ff_tile, d_model, d_ff, xb, wb, ob,
                          resident) > cfg["budget"]):
        row_tile = max(256, row_tile // 2)
    while (not resident and ff_tile > 128 and
           _vmem_estimate(row_tile, ff_tile, d_model, d_ff, xb, wb, ob,
                          resident) > cfg["budget"]):
        ff_tile = _divisor_tile(d_ff, max(128, ff_tile // 2), 128)

    M_pad = _round_up(M, row_tile)
    n_row_tiles = M_pad // row_tile

    x2d = x.reshape(M, d_model)
    if M_pad != M:
        x2d = jnp.pad(x2d, ((0, M_pad - M), (0, 0)))
    b1_2d = b1.reshape(1, d_ff)
    b2_2d = b2.reshape(1, d_model)

    # Raise the scoped-VMEM limit only when the default would be too small.
    vmem_need = _vmem_estimate(row_tile, ff_tile, d_model, d_ff, xb, wb, ob,
                               resident)
    vmem_limit = None
    if vmem_need > (14 << 20):
        vmem_limit = int(min(cfg["budget"],
                             _round_up(vmem_need + (4 << 20), 1 << 20)))

    nbytes = lambda a: a.size * a.dtype.itemsize
    weight_stream = nbytes(w1) + nbytes(w2) + nbytes(b1_2d) + nbytes(b2_2d)
    if not resident:
        weight_stream *= n_row_tiles          # W1/W2 re-streamed per row tile
    cost = pl.CostEstimate(
        flops=4 * M_pad * d_model * d_ff,     # two matmuls, 2 flops per MAC
        transcendentals=0,
        bytes_accessed=nbytes(x2d) + M_pad * d_model * ob + weight_stream,
    )

    # TODO(synk): training-mode dropout would use pltpu.prng_seed/prng_random_bits.
    # TODO(synk): for production, store params in bf16 (int8 v5e/v6e, fp8 v7x)
    #             to halve/quarter the dominant weight HBM stream.

    if resident:
        out2d = pl.pallas_call(
            _ffn_resident_kernel,
            out_shape=jax.ShapeDtypeStruct((M_pad, d_model), x.dtype),
            grid_spec=pltpu.PrefetchScalarGridSpec(
                num_scalar_prefetch=0,
                grid=(n_row_tiles,),
                in_specs=[
                    pl.BlockSpec((row_tile, d_model), lambda i: (i, 0)),  # x rows
                    pl.BlockSpec((d_model, d_ff), lambda i: (0, 0)),      # W1 once
                    pl.BlockSpec((1, d_ff), lambda i: (0, 0)),            # b1 once
                    pl.BlockSpec((d_ff, d_model), lambda i: (0, 0)),      # W2 once
                    pl.BlockSpec((1, d_model), lambda i: (0, 0)),         # b2 once
                ],
                out_specs=pl.BlockSpec((row_tile, d_model), lambda i: (i, 0)),
            ),
            compiler_params=pltpu.CompilerParams(
                dimension_semantics=("parallel",),
                vmem_limit_bytes=vmem_limit),
            cost_estimate=cost,
        )(x2d, w1, b1_2d, w2, b2_2d)
    else:
        f32_out = jnp.dtype(x.dtype) == jnp.dtype(jnp.float32)
        kernel = _ffn_tiled_f32out_kernel if f32_out else _ffn_tiled_kernel
        scratch = [] if f32_out else [pltpu.VMEM((row_tile, d_model), jnp.float32)]
        out2d = pl.pallas_call(
            kernel,
            out_shape=jax.ShapeDtypeStruct((M_pad, d_model), x.dtype),
            grid_spec=pltpu.PrefetchScalarGridSpec(
                num_scalar_prefetch=0,
                grid=(n_row_tiles, d_ff // ff_tile),
                in_specs=[
                    pl.BlockSpec((row_tile, d_model), lambda i, j: (i, 0)),  # x
                    pl.BlockSpec((d_model, ff_tile), lambda i, j: (0, j)),   # W1 cols
                    pl.BlockSpec((1, ff_tile), lambda i, j: (0, j)),         # b1 slab
                    pl.BlockSpec((ff_tile, d_model), lambda i, j: (j, 0)),   # W2 rows
                    pl.BlockSpec((1, d_model), lambda i, j: (0, 0)),         # b2
                ],
                out_specs=pl.BlockSpec((row_tile, d_model), lambda i, j: (i, 0)),
                scratch_shapes=scratch,
            ),
            compiler_params=pltpu.CompilerParams(
                dimension_semantics=("parallel", "arbitrary"),
                vmem_limit_bytes=vmem_limit),
            cost_estimate=cost,
        )(x2d, w1, b1_2d, w2, b2_2d)

    if M_pad != M:
        out2d = out2d[:M]
    return out2d.reshape(B, S, d_model)


# ----------------------------------------------------------------------------
# Param init (matches PyTorch nn.Linear default U(-1/sqrt(fan_in), +bound))
# ----------------------------------------------------------------------------

def init_params(key, d_model, d_ff, dtype=jnp.float32):
    k1, k2, k3, k4 = jax.random.split(key, 4)
    bound1 = 1.0 / math.sqrt(d_model)
    bound2 = 1.0 / math.sqrt(d_ff)
    # Stored already transposed vs. torch Linear: (in_features, out_features).
    w1 = jax.random.uniform(k1, (d_model, d_ff), dtype, -bound1, bound1)
    b1 = jax.random.uniform(k2, (d_ff,), dtype, -bound1, bound1)
    w2 = jax.random.uniform(k3, (d_ff, d_model), dtype, -bound2, bound2)
    b2 = jax.random.uniform(k4, (d_model,), dtype, -bound2, bound2)
    return w1, b1, w2, b2


if __name__ == "__main__":
    key = jax.random.PRNGKey(0)
    kx, kp = jax.random.split(key)

    # Small but lane-friendly shapes (d_model, d_ff multiples of 128).
    batch, seq, d_model, d_ff = 2, 16, 128, 256
    x = jax.random.normal(kx, (batch, seq, d_model), dtype=jnp.float32)
    w1, b1, w2, b2 = init_params(kp, d_model, d_ff)

    # Pure-JAX reference (dropout = identity in eval mode).
    ref = jnp.maximum(x @ w1 + b1, 0.0) @ w2 + b2

    # Weights-resident fast path (auto-selected: W1+W2 are tiny here).
    out = jax.block_until_ready(position_wise_feed_forward(x, w1, b1, w2, b2))
    assert out.shape == (batch, seq, d_model)
    assert jnp.allclose(out, ref, atol=1e-4, rtol=1e-4), "resident path mismatch"

    # d_ff-tiled reduction path (forced, exercises the accumulator variant).
    out_t = jax.block_until_ready(
        position_wise_feed_forward(x, w1, b1, w2, b2, tf=128, resident=False))
    assert jnp.allclose(out_t, ref, atol=1e-4, rtol=1e-4), "tiled path mismatch"

    print("KERNEL_OK")
</pallas_src>

<mosaic_0001>
module attributes {stable_mosaic.version = 11 : i64} {
  func.func @_ffn_resident_kernel(%arg0: i32, %arg1: memref<32x128xf32, #tpu.memory_space<vmem>>, %arg2: memref<128x256xf32, #tpu.memory_space<vmem>>, %arg3: memref<1x256xf32, #tpu.memory_space<vmem>>, %arg4: memref<256x128xf32, #tpu.memory_space<vmem>>, %arg5: memref<1x128xf32, #tpu.memory_space<vmem>>, %arg6: memref<32x128xf32, #tpu.memory_space<vmem>>) attributes {dimension_semantics = [#tpu.dimension_semantics<parallel>], iteration_bounds = array<i64: 1>, scalar_prefetch = 0 : i64, scratch_operands = 0 : i64, tpu.core_type = #tpu.core_type<tc>, window_params = [{transform_indices = @transform_0, window_bounds = array<i64: 32, 128>}, {pipeline_mode = #tpu.pipeline_mode<synchronous>, transform_indices = @transform_1, window_bounds = array<i64: 128, 256>}, {pipeline_mode = #tpu.pipeline_mode<synchronous>, transform_indices = @transform_2, window_bounds = array<i64: 1, 256>}, {pipeline_mode = #tpu.pipeline_mode<synchronous>, transform_indices = @transform_3, window_bounds = array<i64: 256, 128>}, {pipeline_mode = #tpu.pipeline_mode<synchronous>, transform_indices = @transform_4, window_bounds = array<i64: 1, 128>}, {transform_indices = @transform_5, window_bounds = array<i64: 32, 128>}]} {
    %c0 = arith.constant 0 : index
    %c0_0 = arith.constant 0 : index
    %0 = vector.load %arg1[%c0, %c0_0] : memref<32x128xf32, #tpu.memory_space<vmem>>, vector<32x128xf32>
    %c0_1 = arith.constant 0 : index
    %c0_2 = arith.constant 0 : index
    %1 = vector.load %arg2[%c0_1, %c0_2] : memref<128x256xf32, #tpu.memory_space<vmem>>, vector<128x256xf32>
    %cst = arith.constant dense<0.000000e+00> : vector<32x256xf32>
    %2 = tpu.matmul %0, %1, %cst {dimension_numbers = #tpu.dot_dimension_numbers<[1], [0], [0], [1], [0, 0, 1, 1], [], []>} : vector<32x128xf32>, vector<128x256xf32>, vector<32x256xf32> -> vector<32x256xf32>
    %c0_3 = arith.constant 0 : index
    %c0_4 = arith.constant 0 : index
    %3 = vector.load %arg3[%c0_3, %c0_4] : memref<1x256xf32, #tpu.memory_space<vmem>>, vector<1x256xf32>
    %4 = vector.broadcast %3 : vector<1x256xf32> to vector<32x256xf32>
    %5 = arith.addf %2, %4 : vector<32x256xf32>
    %cst_5 = arith.constant 0.000000e+00 : f32
    %6 = vector.broadcast %cst_5 : f32 to vector<32x256xf32>
    %7 = arith.maximumf %5, %6 : vector<32x256xf32>
    %c0_6 = arith.constant 0 : index
    %c0_7 = arith.constant 0 : index
    %8 = vector.load %arg4[%c0_6, %c0_7] : memref<256x128xf32, #tpu.memory_space<vmem>>, vector<256x128xf32>
    %cst_8 = arith.constant dense<0.000000e+00> : vector<32x128xf32>
    %9 = tpu.matmul %7, %8, %cst_8 {dimension_numbers = #tpu.dot_dimension_numbers<[1], [0], [0], [1], [0, 0, 1, 1], [], []>} : vector<32x256xf32>, vector<256x128xf32>, vector<32x128xf32> -> vector<32x128xf32>
    %c0_9 = arith.constant 0 : index
    %c0_10 = arith.constant 0 : index
    %10 = vector.load %arg5[%c0_9, %c0_10] : memref<1x128xf32, #tpu.memory_space<vmem>>, vector<1x128xf32>
    %11 = vector.broadcast %10 : vector<1x128xf32> to vector<32x128xf32>
    %12 = arith.addf %9, %11 : vector<32x128xf32>
    %c0_11 = arith.constant 0 : index
    %c0_12 = arith.constant 0 : index
    %13 = vector.load %arg6[%c0_11, %c0_12] : memref<32x128xf32, #tpu.memory_space<vmem>>, vector<32x128xf32>
    tpu.vector_store %arg6[%c0_11, %c0_12], %12 {strides = array<i32>} : memref<32x128xf32, #tpu.memory_space<vmem>>, vector<32x128xf32>,
    return
  }
  func.func @transform_0(%arg0: i32) -> (i32, i32) {
    %c0_i32 = arith.constant 0 : i32
    %c0_i32_0 = arith.constant 0 : i32
    return %arg0, %c0_i32 : i32, i32
  }
  func.func @transform_1(%arg0: i32) -> (i32, i32) {
    %c0_i32 = arith.constant 0 : i32
    %c0_i32_0 = arith.constant 0 : i32
    %c0_i32_1 = arith.constant 0 : i32
    return %c0_i32, %c0_i32_0 : i32, i32
  }
  func.func @transform_2(%arg0: i32) -> (i32, i32) {
    %c0_i32 = arith.constant 0 : i32
    %c0_i32_0 = arith.constant 0 : i32
    %c0_i32_1 = arith.constant 0 : i32
    return %c0_i32, %c0_i32_0 : i32, i32
  }
  func.func @transform_3(%arg0: i32) -> (i32, i32) {
    %c0_i32 = arith.constant 0 : i32
    %c0_i32_0 = arith.constant 0 : i32
    %c0_i32_1 = arith.constant 0 : i32
    return %c0_i32, %c0_i32_0 : i32, i32
  }
  func.func @transform_4(%arg0: i32) -> (i32, i32) {
    %c0_i32 = arith.constant 0 : i32
    %c0_i32_0 = arith.constant 0 : i32
    %c0_i32_1 = arith.constant 0 : i32
    return %c0_i32, %c0_i32_0 : i32, i32
  }
  func.func @transform_5(%arg0: i32) -> (i32, i32) {
    %c0_i32 = arith.constant 0 : i32
    %c0_i32_0 = arith.constant 0 : i32
    return %arg0, %c0_i32 : i32, i32
  }
}

</mosaic_0001>

<bundles_post_ra>
// kernel: position_wise_feed_forward.1
= control target key start
LH: loop header
LB: loop body
LE: loop exit
PB: predicated region body
PF: predicated region fallthrough
CT: control target
= control target key end

     0   :  { %10 = vsyncpa [#allocation3], 0  ;;  %s470_s0 = inlined_call_operand.hbm [shape: f32[32,128], index: 0, kind: input, shape index: {}]   ;;  %s471_s1 = inlined_call_operand.hbm [shape: f32[128,256], index: 1, kind: input, shape index: {}]   ;;  %s472_s2 = inlined_call_operand.vmem [shape: f32[1,256], index: 2, kind: input, shape index: {}]   ;;  %s473_s3 = inlined_call_operand.hbm [shape: f32[256,128], index: 3, kind: input, shape index: {}]   ;;  %s474_s4 = inlined_call_operand.vmem [shape: f32[1,128], index: 4, kind: input, shape index: {}]   ;;  %s475_s5 = inlined_call_operand.hbm [shape: f32[32,128], index: 5, kind: output, shape index: {}]  }
   0x1   :  { %11 = vsyncpa [#allocation6], 0  ;;  %s30_s20 = sshll.u32 %s471_s1, 4  ;;  %s31_s20 = int_to_ptr.hbm [resolvable:$true] %s30_s20 }
   0x2   :  { %12 = vsyncpa [#allocation4], 0  ;;  %s405_s21 = smov [#allocation5]   ;;  %s17_s25 = sshll.u32 %s470_s0, 4  ;;  %s18_s25 = int_to_ptr.hbm [resolvable:$true] %s17_s25 }
   0x3   :  { %s32_s22 = sshll.u32 %s405_s21, 4  ;;  %s406_s26 = smov 256   ;;  %s33_s22 = int_to_ptr.vmem [resolvable:$true] %s32_s22 }
   0x4   :  { %s407_s27 = smov 16   ;;  %s408_s28 = smov [#allocation2]  }
   0x5   :  { %38 = dma.hbm_to_vmem [thread:$0]  %s31_s20, 4096, %s33_s22, [#allocation6], %s406_s26, %s406_s26, %s407_s27  }
   0x6   :  { %s19_s29 = sshll.u32 %s408_s28, 4  ;;  %s409_s30 = smov 128   ;;  %s20_s29 = int_to_ptr.vmem [resolvable:$true] %s19_s29 }
   0x7   :  { %s410_s6 = smov 8   ;;  %s45_s8 = sshll.u32 %s473_s3, 4  ;;  %s46_s8 = int_to_ptr.hbm [resolvable:$true] %s45_s8 }
   0x8   :  { %25 = dma.hbm_to_vmem [thread:$0]  %s18_s25, 512, %s20_s29, [#allocation3], %s409_s30, %s409_s30, %s410_s6  }
   0x9   :  { %s411_s9 = smov [#allocation7]  }
   0xa   :  { %s47_s0 = sshll.u32 %s411_s9, 4  ;;  %s48_s0 = int_to_ptr.vmem [resolvable:$true] %s47_s0 }
   0xb   :  { %53 = dma.hbm_to_vmem [thread:$0]  %s46_s8, 4096, %s48_s0, [#allocation6], %s409_s30, %s409_s30, %s410_s6  }
   0xc   :  { %399 = dma.done.wait [#allocation3], 512  }
   0xd   :  { %400 = vsyncadd [#allocation3], 4294966784 }
   0xe   :  { %401 = dma.done.wait [#allocation6], 8192  }
   0xf   :  { %402 = vsyncadd [#allocation6], 4294959104  ;;  %v102_v0 = vld [vmem:[#allocation5 + $0xf0] sm:$0xff]  ;;  %v100_v1 = vld [vmem:[#allocation5 + $0xe0] sm:$0xff]  ;;  %s412_s12 = smov [#allocation8]   ;;  %s280_s15 = sshll.u32 %s475_s5, 4  ;;  %s281_s15 = int_to_ptr.hbm [resolvable:$true] %s280_s15 }
  0x10   :  { %v103_v2 = vld [vmem:[#allocation5 + $0xf8] sm:$0xff]  ;;  %110 = vmatpush.msra.mxu0 %v102_v0  ;;  %v101_v3 = vld [vmem:[#allocation5 + $0xe8] sm:$0xff]  ;;  %v98_v4 = vld [vmem:[#allocation5 + $0xd0] sm:$0xff]  ;;  %s278_s13 = sshll.u32 %s412_s12, 4  ;;  %s279_s13 = int_to_ptr.vmem [resolvable:$true] %s278_s13 }
  0x11   :  { %139 = vmatpush.msra.mxu1 %v103_v2  ;;  %v99_v5 = vld [vmem:[#allocation5 + $0xd8] sm:$0xff]  ;;  %v96_v6 = vld [vmem:[#allocation5 + $0xc0] sm:$0xff]  ;;  %v97_v7 = vld [vmem:[#allocation5 + $0xc8] sm:$0xff] }
  0x12   :  { %111 = vmatpush.msra.mxu0 %v100_v1  ;;  %v94_v8 = vld [vmem:[#allocation5 + $0xb0] sm:$0xff]  ;;  %v95_v9 = vld [vmem:[#allocation5 + $0xb8] sm:$0xff]  ;;  %v92_v10 = vld [vmem:[#allocation5 + $0xa0] sm:$0xff] }
  0x13   :  { %140 = vmatpush.msra.mxu1 %v101_v3  ;;  %v93_v11 = vld [vmem:[#allocation5 + $0xa8] sm:$0xff]  ;;  %v90_v12 = vld [vmem:[#allocation5 + $0x90] sm:$0xff]  ;;  %v91_v13 = vld [vmem:[#allocation5 + $0x98] sm:$0xff] }
  0x14   :  { %112 = vmatpush.msra.mxu0 %v98_v4  ;;  %v88_v14 = vld [vmem:[#allocation5 + $0x80] sm:$0xff]  ;;  %v89_v15 = vld [vmem:[#allocation5 + $0x88] sm:$0xff]  ;;  %v86_v16 = vld [vmem:[#allocation5 + $0x70] sm:$0xff] }
  0x15   :  { %141 = vmatpush.msra.mxu1 %v99_v5  ;;  %v87_v17 = vld [vmem:[#allocation5 + $0x78] sm:$0xff]  ;;  %v84_v18 = vld [vmem:[#allocation5 + $0x60] sm:$0xff]  ;;  %v85_v19 = vld [vmem:[#allocation5 + $0x68] sm:$0xff] }
  0x16   :  { %113 = vmatpush.msra.mxu0 %v96_v6  ;;  %v82_v20 = vld [vmem:[#allocation5 + $0x50] sm:$0xff]  ;;  %v83_v21 = vld [vmem:[#allocation5 + $0x58] sm:$0xff]  ;;  %v80_v22 = vld [vmem:[#allocation5 + $0x40] sm:$0xff] }
  0x17   :  { %142 = vmatpush.msra.mxu1 %v97_v7  ;;  %v81_v23 = vld [vmem:[#allocation5 + $0x48] sm:$0xff]  ;;  %v78_v24 = vld [vmem:[#allocation5 + $0x30] sm:$0xff]  ;;  %v79_v25 = vld [vmem:[#allocation5 + $0x38] sm:$0xff] }
  0x18   :  { %114 = vmatpush.msra.mxu0 %v94_v8  ;;  %v76_v26 = vld [vmem:[#allocation5 + $0x20] sm:$0xff]  ;;  %v77_v27 = vld [vmem:[#allocation5 + $0x28] sm:$0xff]  ;;  %v191_v28 = vld [vmem:[#allocation7 + $0x78] sm:$0xff] }
  0x19   :  { %143 = vmatpush.msra.mxu1 %v95_v9  ;;  %v207_v29 = vld [vmem:[#allocation7 + $0xf8] sm:$0xff]  ;;  %v190_v30 = vld [vmem:[#allocation7 + $0x70] sm:$0xff]  ;;  %212 = vmatpush.msra.mxu2 %v191_v28  ;;  %v189_v34 = vld [vmem:[#allocation7 + $0x68] sm:$0xff] }
  0x1a   :  { %115 = vmatpush.msra.mxu0 %v92_v10  ;;  %v206_v31 = vld [vmem:[#allocation7 + $0xf0] sm:$0xff]  ;;  %v75_v33 = vld [vmem:[#allocation5 + $0x18] sm:$0xff]  ;;  %241 = vmatpush.msra.mxu3 %v207_v29  ;;  %v205_v35 = vld [vmem:[#allocation7 + $0xe8] sm:$0xff] }
  0x1b   :  { %144 = vmatpush.msra.mxu1 %v93_v11  ;;  %v74_v32 = vld [vmem:[#allocation5 + $0x10] sm:$0xff]  ;;  %v72_v36 = vld [vmem:[#allocation5] sm:$0xff]  ;;  %v73_v37 = vld [vmem:[#allocation5 + $0x8] sm:$0xff]  ;;  %213 = vmatpush.msra.mxu2 %v190_v30 }
  0x1c   :  { %116 = vmatpush.msra.mxu0 %v90_v12  ;;  %242 = vmatpush.msra.mxu3 %v206_v31  ;;  %v68_v38 = vld [vmem:[#allocation2] sm:$0xff]  ;;  %v187_v41 = vld [vmem:[#allocation7 + $0x58] sm:$0xff]  ;;  %v186_v43 = vld [vmem:[#allocation7 + $0x50] sm:$0xff] }
  0x1d   :  { %145 = vmatpush.msra.mxu1 %v91_v13  ;;  %214 = vmatpush.msra.mxu2 %v189_v34  ;;  %v188_v39 = vld [vmem:[#allocation7 + $0x60] sm:$0xff]  ;;  %v203_v42 = vld [vmem:[#allocation7 + $0xd8] sm:$0xff]  ;;  %v202_v44 = vld [vmem:[#allocation7 + $0xd0] sm:$0xff] }
  0x1e   :  { %117 = vmatpush.msra.mxu0 %v88_v14  ;;  %243 = vmatpush.msra.mxu3 %v205_v35  ;;  %v204_v40 = vld [vmem:[#allocation7 + $0xe0] sm:$0xff]  ;;  %v185_v45 = vld [vmem:[#allocation7 + $0x48] sm:$0xff]  ;;  %v183_v50 = vld [vmem:[#allocation7 + $0x38] sm:$0xff] }
  0x1f   :  { %146 = vmatpush.msra.mxu1 %v89_v15  ;;  %215 = vmatpush.msra.mxu2 %v188_v39  ;;  %v201_v46 = vld [vmem:[#allocation7 + $0xc8] sm:$0xff]  ;;  %v184_v48 = vld [vmem:[#allocation7 + $0x40] sm:$0xff]  ;;  %v199_v51 = vld [vmem:[#allocation7 + $0xb8] sm:$0xff] }
  0x20   :  { %118 = vmatpush.msra.mxu0 %v86_v16  ;;  %244 = vmatpush.msra.mxu3 %v204_v40  ;;  %v69_v47 = vld [vmem:[#allocation2 + $0x8] sm:$0xff]  ;;  %v200_v49 = vld [vmem:[#allocation7 + $0xc0] sm:$0xff]  ;;  %v182_v52 = vld [vmem:[#allocation7 + $0x30] sm:$0xff] }
  0x21   :  { %147 = vmatpush.msra.mxu1 %v87_v17  ;;  %216 = vmatpush.msra.mxu2 %v187_v41  ;;  %v198_v53 = vld [vmem:[#allocation7 + $0xb0] sm:$0xff]  ;;  %v181_v54 = vld [vmem:[#allocation7 + $0x28] sm:$0xff]  ;;  %v180_v57 = vld [vmem:[#allocation7 + $0x20] sm:$0xff] }
  0x22   :  { %119 = vmatpush.msra.mxu0 %v84_v18  ;;  %245 = vmatpush.msra.mxu3 %v203_v42  ;;  %v197_v55 = vld [vmem:[#allocation7 + $0xa8] sm:$0xff]  ;;  %v70_v56 = vld [vmem:[#allocation2 + $0x10] sm:$0xff]  ;;  %v196_v58 = vld [vmem:[#allocation7 + $0xa0] sm:$0xff] }
  0x23   :  { %148 = vmatpush.msra.mxu1 %v85_v19  ;;  %217 = vmatpush.msra.mxu2 %v186_v43  ;;  %v179_v59 = vld [vmem:[#allocation7 + $0x18] sm:$0xff]  ;;  %v178_v61 = vld [vmem:[#allocation7 + $0x10] sm:$0xff]  ;;  %v177_v63 = vld [vmem:[#allocation7 + $0x8] sm:$0xff] }
  0x24   :  { %120 = vmatpush.msra.mxu0 %v82_v20  ;;  %246 = vmatpush.msra.mxu3 %v202_v44  ;;  %v71_v60 = vld [vmem:[#allocation2 + $0x18] sm:$0xff]  ;;  %v194_v0 = vld [vmem:[#allocation7 + $0x90] sm:$0xff]  ;;  %v176_v1 = vld [vmem:[#allocation7] sm:$0xff] }
  0x25   :  { %149 = vmatpush.msra.mxu1 %v83_v21  ;;  %218 = vmatpush.msra.mxu2 %v185_v45  ;;  %v195_v62 = vld [vmem:[#allocation7 + $0x98] sm:$0xff]  ;;  %v193_v2 = vld [vmem:[#allocation7 + $0x88] sm:$0xff]  ;;  %v192_v3 = vld [vmem:[#allocation7 + $0x80] sm:$0xff] }
  0x26   :  { %121 = vmatpush.msra.mxu0 %v80_v22  ;;  %247 = vmatpush.msra.mxu3 %v201_v46  ;;  %v104_v4 = vld [vmem:[%s472_s2] sm:$0x3] }
  0x27   :  { %150 = vmatpush.msra.mxu1 %v81_v23  ;;  %219 = vmatpush.msra.mxu2 %v184_v48  ;;  %v106_v5 = vperm.slane %v104_v4, 0  ;;  %v107_v6 = vperm.slane %v104_v4, 1  ;;  %v302_v31 = vld [vmem:[%s474_s4] ss:$0 sm:$0xff] }
  0x28   :  { %122 = vmatpush.msra.mxu0 %v78_v24  ;;  %248 = vmatpush.msra.mxu3 %v200_v49 }
  0x29   :  { %151 = vmatpush.msra.mxu1 %v79_v25  ;;  %220 = vmatpush.msra.mxu2 %v183_v50 }
  0x2a   :  { %123 = vmatpush.msra.mxu0 %v76_v26  ;;  %249 = vmatpush.msra.mxu3 %v199_v51 }
  0x2b   :  { %152 = vmatpush.msra.mxu1 %v77_v27  ;;  %221 = vmatpush.msra.mxu2 %v182_v52 }
  0x2c   :  { %124 = vmatpush.msra.mxu0 %v74_v32  ;;  %250 = vmatpush.msra.mxu3 %v198_v53 }
  0x2d   :  { %153 = vmatpush.msra.mxu1 %v75_v33  ;;  %222 = vmatpush.msra.mxu2 %v181_v54 }
  0x2e   :  { %125 = vmatpush.msra.mxu0 %v72_v36  ;;  %251 = vmatpush.msra.mxu3 %v197_v55 }
  0x2f   :  { %154 = vmatpush.msra.mxu1 %v73_v37  ;;  %126 = vmatmul.f32.vlgmr.msra.gmra.mxu0 %v68_v38 }
  0x30   :  { %155 = vmatmul.f32.vlgmr.msra.gmra.mxu1 %v68_v38  ;;  %223 = vmatpush.msra.mxu2 %v180_v57 }
  0x31   :  { %252 = vmatpush.msra.mxu3 %v196_v58 }
  0x32   :  { %224 = vmatpush.msra.mxu2 %v179_v59 }
  0x33   :  { %253 = vmatpush.msra.mxu3 %v195_v62 }
  0x34   :  { %225 = vmatpush.msra.mxu2 %v178_v61 }
  0x35   :  { %254 = vmatpush.msra.mxu3 %v194_v0 }
  0x36   :  { %226 = vmatpush.msra.mxu2 %v177_v63 }
  0x37   :  { %129 = vmatmul.f32.gmra.mxu0 %v69_v47  ;;  %255 = vmatpush.msra.mxu3 %v193_v2 }
  0x38   :  { %158 = vmatmul.f32.gmra.mxu1 %v69_v47  ;;  %227 = vmatpush.msra.mxu2 %v176_v1 }
  0x39   :  { %256 = vmatpush.msra.mxu3 %v192_v3 }
  0x3f   :  { %132 = vmatmul.f32.gmra.mxu0 %v70_v56 }
  0x40   :  { %161 = vmatmul.f32.gmra.mxu1 %v70_v56 }
  0x47   :  { %135 = vmatmul.f32.gmra.mxu0 %v71_v60 }
  0x48   :  { %164 = vmatmul.f32.gmra.mxu1 %v71_v60 }
  0xac   :  { %v127_v7 = vpop.f32.mrf.mxu0 }
  0xad   :  { %v156_v8 = vpop.f32.mrf.mxu1  ;;  %v128_v9 = vadd.f32 %v127_v7, %v106_v5 }
  0xae   :  { %v157_v10 = vadd.f32 %v156_v8, %v107_v6 }
  0xaf   :  { %v168_v11 = vmax.f32 %v128_v9, 0.0 }
  0xb0   :  { %v169_v12 = vmax.f32 %v157_v10, 0.0 }
  0xb1   :  { %228 = vmatmul.f32.vlgmr.msra.gmra.mxu2 %v168_v11 }
  0xb2   :  { %257 = vmatmul.f32.vlgmr.msra.gmra.mxu3 %v169_v12 }
  0xb4   :  { %v130_v13 = vpop.f32.mrf.mxu0 }
  0xb5   :  { %v159_v14 = vpop.f32.mrf.mxu1  ;;  %v131_v15 = vadd.f32 %v130_v13, %v106_v5 }
  0xb6   :  { %v160_v16 = vadd.f32 %v159_v14, %v107_v6 }
  0xb7   :  { %v170_v17 = vmax.f32 %v131_v15, 0.0 }
  0xb8   :  { %v171_v18 = vmax.f32 %v160_v16, 0.0 }
  0xb9   :  { %231 = vmatmul.f32.gmra.mxu2 %v170_v17 }
  0xba   :  { %260 = vmatmul.f32.gmra.mxu3 %v171_v18 }
  0xbc   :  { %v133_v19 = vpop.f32.mrf.mxu0 }
  0xbd   :  { %v162_v20 = vpop.f32.mrf.mxu1  ;;  %v134_v21 = vadd.f32 %v133_v19, %v106_v5 }
  0xbe   :  { %v163_v22 = vadd.f32 %v162_v20, %v107_v6 }
  0xbf   :  { %v172_v23 = vmax.f32 %v134_v21, 0.0 }
  0xc0   :  { %v173_v24 = vmax.f32 %v163_v22, 0.0 }
  0xc1   :  { %234 = vmatmul.f32.gmra.mxu2 %v172_v23 }
  0xc2   :  { %263 = vmatmul.f32.gmra.mxu3 %v173_v24 }
  0xc4   :  { %v136_v25 = vpop.f32.mrf.mxu0 }
  0xc5   :  { %v165_v26 = vpop.f32.mrf.mxu1  ;;  %v137_v27 = vadd.f32 %v136_v25, %v106_v5 }
  0xc6   :  { %v166_v28 = vadd.f32 %v165_v26, %v107_v6 }
  0xc7   :  { %v174_v29 = vmax.f32 %v137_v27, 0.0 }
  0xc8   :  { %v175_v30 = vmax.f32 %v166_v28, 0.0 }
  0xc9   :  { %237 = vmatmul.f32.gmra.mxu2 %v174_v29 }
  0xca   :  { %266 = vmatmul.f32.gmra.mxu3 %v175_v30 }
 0x134   :  { %v229_v32 = vpop.f32.mrf.mxu2 }
 0x135   :  { %v258_v33 = vpop.f32.mrf.mxu3  ;;  %v230_v34 = vadd.f32 %v302_v31, %v229_v32 }
 0x137   :  { %v259_v35 = vadd.f32 %v258_v33, %v230_v34 }
 0x139   :  { %270 = vst [vmem:[#allocation8] sm:$0xff] %v259_v35 }
 0x13c   :  { %v232_v36 = vpop.f32.mrf.mxu2 }
 0x13d   :  { %v261_v37 = vpop.f32.mrf.mxu3  ;;  %v233_v38 = vadd.f32 %v302_v31, %v232_v36 }
 0x13f   :  { %v262_v39 = vadd.f32 %v261_v37, %v233_v38 }
 0x141   :  { %271 = vst [vmem:[#allocation8 + $0x8] sm:$0xff] %v262_v39 }
 0x144   :  { %v235_v40 = vpop.f32.mrf.mxu2 }
 0x145   :  { %v264_v41 = vpop.f32.mrf.mxu3  ;;  %v236_v42 = vadd.f32 %v302_v31, %v235_v40 }
 0x147   :  { %v265_v43 = vadd.f32 %v264_v41, %v236_v42 }
 0x149   :  { %272 = vst [vmem:[#allocation8 + $0x10] sm:$0xff] %v265_v43 }
 0x14c   :  { %v238_v44 = vpop.f32.mrf.mxu2 }
 0x14d   :  { %v267_v45 = vpop.f32.mrf.mxu3  ;;  %v239_v46 = vadd.f32 %v302_v31, %v238_v44 }
 0x14f   :  { %v268_v47 = vadd.f32 %v267_v45, %v239_v46 }
 0x151   :  { %273 = vst [vmem:[#allocation8 + $0x18] sm:$0xff] %v268_v47 }
 0x152   :  { %286 = dma.vmem_to_hbm [thread:$0]  %s279_s13, 512, %s281_s15, [#allocation4], %s409_s30, %s409_s30, %s410_s6  }
 0x153   :  { %403 = dma.done.wait [#allocation4], 512  }
 0x154   :  { %404 = vsyncadd [#allocation4], 4294966784 }
 0x155   :  { %291 = vsyncpa [#allocation3], 1 }
 0x156   :  { %292 = vsyncpa [#allocation6], 1 }
 0x157   :  { %293 = vsyncpa [#allocation4], 1 }

</bundles_post_ra>
